<compile_context>
chip_gen: v6e
topology: v6e:2x2x1
jax: 0.10.0
libtpu: 0.0.40
codegen_flags: <defaults>
</compile_context>

<pallas_src>
import jax
import jax.numpy as jnp
from jax.experimental import pallas as pl
from jax.experimental.pallas import tpu as pltpu


def reward_model_kernel(x_ref, w1t_ref, b1_ref, w2_ref, b2_ref, o_ref):
    x = x_ref[...]                                  # (D_in, TB)
    w1t = w1t_ref[...]                              # (H, D_in)
    d_in = x_ref.shape[0]

    # fc1 on the VPU: H x TB accumulated from D_in broadcast FMAs (D_in is
    # tiny and static, so this is an unrolled trace-time loop).
    h = w1t[:, 0:1] * x[0:1, :]                     # (H, 1) * (1, TB) -> (H, TB)
    for k in range(1, d_in):
        h = h + w1t[:, k:k + 1] * x[k:k + 1, :]
    h = h + b1_ref[...]                             # (H, 1) broadcast
    h = jnp.maximum(h, 0.0)                         # ReLU

    # fc2 on the VPU/XLU: elementwise scale by w2 then sublane reduce.
    y = jnp.sum(h * w2_ref[...], axis=0, keepdims=True)   # (1, TB)
    y = y + b2_ref[...]                             # (1, 1) broadcast
    o_ref[...] = y.astype(o_ref.dtype)


def reward_model_forward(x, w1, b1, w2, b2, *, tb=512):
    """x: (B, D_in) f32; w1: (D_in, H); b1: (1, H); w2: (H, 1); b2: (1, 1).

    Returns (B, 1) f32, matching PyTorch's fc2(relu(fc1(x))).
    """
    B, d_in = x.shape
    hidden = w1.shape[1]

    # Batch tile: multiple of 128 lanes, clamped so tiny batches get one block.
    tb = max(128, min(tb, ((B + 127) // 128) * 128))
    Bp = ((B + tb - 1) // tb) * tb

    # Layout plumbing in the wrapper (not the kernel): batch on the lane axis.
    xt = x.T                                        # (D_in, B)
    if Bp != B:
        xt = jnp.pad(xt, ((0, 0), (0, Bp - B)))     # padded cols are sliced off
    w1t = w1.T                                      # (H, D_in)
    b1c = b1.reshape(hidden, 1)                     # (H, 1)
    w2c = w2.reshape(hidden, 1)                     # (H, 1)
    b2c = b2.reshape(1, 1)                          # (1, 1)

    grid = (Bp // tb,)
    flops = 2 * Bp * (d_in * hidden + hidden * 1)
    bytes_accessed = 4 * (Bp * d_in + Bp * 1
                          + d_in * hidden + hidden + hidden + 1)

    out = pl.pallas_call(
        reward_model_kernel,
        out_shape=jax.ShapeDtypeStruct((1, Bp), jnp.float32),
        grid=grid,
        in_specs=[
            # x: tiled along batch (lane axis).
            pl.BlockSpec((d_in, tb), lambda i: (0, i)),
            # Weights/biases: full arrays, constant block -> VMEM-resident.
            pl.BlockSpec((hidden, d_in), lambda i: (0, 0)),
            pl.BlockSpec((hidden, 1), lambda i: (0, 0)),
            pl.BlockSpec((hidden, 1), lambda i: (0, 0)),
            pl.BlockSpec((1, 1), lambda i: (0, 0)),
        ],
        out_specs=pl.BlockSpec((1, tb), lambda i: (0, i)),
        compiler_params=pltpu.CompilerParams(
            dimension_semantics=("parallel",)),
        cost_estimate=pl.CostEstimate(
            flops=flops, transcendentals=0, bytes_accessed=bytes_accessed),
    )(xt, w1t, b1c, w2c, b2c)

    return out[:, :B].T                             # (B, 1)


def init_params(key, input_dim=3, hidden=16, out_dim=1):
    """Deterministic init mimicking nn.Linear's uniform(-1/sqrt(fan_in), +)."""
    k1, k2, k3, k4 = jax.random.split(key, 4)
    bound1 = 1.0 / jnp.sqrt(jnp.float32(input_dim))
    bound2 = 1.0 / jnp.sqrt(jnp.float32(hidden))
    w1 = jax.random.uniform(k1, (input_dim, hidden), jnp.float32, -bound1, bound1)
    b1 = jax.random.uniform(k2, (1, hidden), jnp.float32, -bound1, bound1)
    w2 = jax.random.uniform(k3, (hidden, out_dim), jnp.float32, -bound2, bound2)
    b2 = jax.random.uniform(k4, (1, out_dim), jnp.float32, -bound2, bound2)
    return w1, b1, w2, b2


if __name__ == "__main__":
    key = jax.random.PRNGKey(0)
    k_params, k_x = jax.random.split(key)

    input_dim = 3
    batch = 8   # small demo batch; kernel pads to one 128-lane tile

    w1, b1, w2, b2 = init_params(k_params, input_dim=input_dim)
    x = jax.random.normal(k_x, (batch, input_dim), jnp.float32)

    out = reward_model_forward(x, w1, b1, w2, b2)
    out = jax.block_until_ready(out)

    # Reference check in plain JAX (same semantics as the PyTorch module).
    ref = jnp.maximum(x @ w1 + b1, 0.0) @ w2 + b2
    assert out.shape == (batch, 1)
    assert jnp.allclose(out, ref, atol=1e-5, rtol=1e-5)

    # Also exercise a multi-grid-step (pipelined) batch to validate tiling.
    big_x = jax.random.normal(jax.random.PRNGKey(1), (1500, input_dim), jnp.float32)
    big_out = jax.block_until_ready(reward_model_forward(big_x, w1, b1, w2, b2))
    big_ref = jnp.maximum(big_x @ w1 + b1, 0.0) @ w2 + b2
    assert big_out.shape == (1500, 1)
    assert jnp.allclose(big_out, big_ref, atol=1e-5, rtol=1e-5)

    print("KERNEL_OK")
</pallas_src>

<mosaic_0001>
module attributes {stable_mosaic.version = 11 : i64} {
  func.func @reward_model_kernel(%arg0: i32, %arg1: memref<3x128xf32, #tpu.memory_space<vmem>>, %arg2: memref<16x3xf32, #tpu.memory_space<vmem>>, %arg3: memref<16x1xf32, #tpu.memory_space<vmem>>, %arg4: memref<16x1xf32, #tpu.memory_space<vmem>>, %arg5: memref<1x1xf32, #tpu.memory_space<vmem>>, %arg6: memref<1x128xf32, #tpu.memory_space<vmem>>) attributes {dimension_semantics = [#tpu.dimension_semantics<parallel>], iteration_bounds = array<i64: 1>, scalar_prefetch = 0 : i64, scratch_operands = 0 : i64, tpu.core_type = #tpu.core_type<tc>, window_params = [{transform_indices = @transform_0, window_bounds = array<i64: 3, 128>}, {pipeline_mode = #tpu.pipeline_mode<synchronous>, transform_indices = @transform_1, window_bounds = array<i64: 16, 3>}, {pipeline_mode = #tpu.pipeline_mode<synchronous>, transform_indices = @transform_2, window_bounds = array<i64: 16, 1>}, {pipeline_mode = #tpu.pipeline_mode<synchronous>, transform_indices = @transform_3, window_bounds = array<i64: 16, 1>}, {pipeline_mode = #tpu.pipeline_mode<synchronous>, transform_indices = @transform_4, window_bounds = array<i64: 1, 1>}, {transform_indices = @transform_5, window_bounds = array<i64: 1, 128>}]} {
    %c0 = arith.constant 0 : index
    %c0_0 = arith.constant 0 : index
    %0 = vector.load %arg1[%c0, %c0_0] : memref<3x128xf32, #tpu.memory_space<vmem>>, vector<3x128xf32>
    %c0_1 = arith.constant 0 : index
    %c0_2 = arith.constant 0 : index
    %1 = vector.load %arg2[%c0_1, %c0_2] : memref<16x3xf32, #tpu.memory_space<vmem>>, vector<16x3xf32>
    %2 = vector.extract_strided_slice %1 {offsets = [0, 0], sizes = [16, 1], strides = [1, 1]} : vector<16x3xf32> to vector<16x1xf32>
    %3 = vector.extract_strided_slice %0 {offsets = [0, 0], sizes = [1, 128], strides = [1, 1]} : vector<3x128xf32> to vector<1x128xf32>
    %4 = vector.broadcast %2 : vector<16x1xf32> to vector<16x128xf32>
    %5 = vector.broadcast %3 : vector<1x128xf32> to vector<16x128xf32>
    %6 = arith.mulf %4, %5 : vector<16x128xf32>
    %7 = vector.extract_strided_slice %1 {offsets = [0, 1], sizes = [16, 1], strides = [1, 1]} : vector<16x3xf32> to vector<16x1xf32>
    %8 = vector.extract_strided_slice %0 {offsets = [1, 0], sizes = [1, 128], strides = [1, 1]} : vector<3x128xf32> to vector<1x128xf32>
    %9 = vector.broadcast %7 : vector<16x1xf32> to vector<16x128xf32>
    %10 = vector.broadcast %8 : vector<1x128xf32> to vector<16x128xf32>
    %11 = arith.mulf %9, %10 : vector<16x128xf32>
    %12 = arith.addf %6, %11 : vector<16x128xf32>
    %13 = vector.extract_strided_slice %1 {offsets = [0, 2], sizes = [16, 1], strides = [1, 1]} : vector<16x3xf32> to vector<16x1xf32>
    %14 = vector.extract_strided_slice %0 {offsets = [2, 0], sizes = [1, 128], strides = [1, 1]} : vector<3x128xf32> to vector<1x128xf32>
    %15 = vector.broadcast %13 : vector<16x1xf32> to vector<16x128xf32>
    %16 = vector.broadcast %14 : vector<1x128xf32> to vector<16x128xf32>
    %17 = arith.mulf %15, %16 : vector<16x128xf32>
    %18 = arith.addf %12, %17 : vector<16x128xf32>
    %c0_3 = arith.constant 0 : index
    %c0_4 = arith.constant 0 : index
    %19 = vector.load %arg3[%c0_3, %c0_4] : memref<16x1xf32, #tpu.memory_space<vmem>>, vector<16x1xf32>
    %20 = vector.broadcast %19 : vector<16x1xf32> to vector<16x128xf32>
    %21 = arith.addf %18, %20 : vector<16x128xf32>
    %cst = arith.constant 0.000000e+00 : f32
    %22 = vector.broadcast %cst : f32 to vector<16x128xf32>
    %23 = arith.maximumf %21, %22 : vector<16x128xf32>
    %c0_5 = arith.constant 0 : index
    %c0_6 = arith.constant 0 : index
    %24 = vector.load %arg4[%c0_5, %c0_6] : memref<16x1xf32, #tpu.memory_space<vmem>>, vector<16x1xf32>
    %25 = vector.broadcast %24 : vector<16x1xf32> to vector<16x128xf32>
    %26 = arith.mulf %23, %25 : vector<16x128xf32>
    %cst_7 = arith.constant dense<0.000000e+00> : vector<128xf32>
    %27 = vector.multi_reduction <add>, %26, %cst_7 [0] : vector<16x128xf32> to vector<128xf32>
    %28 = vector.shape_cast %27 : vector<128xf32> to vector<1x128xf32>
    %c0_8 = arith.constant 0 : index
    %c0_9 = arith.constant 0 : index
    %29 = vector.load %arg5[%c0_8, %c0_9] : memref<1x1xf32, #tpu.memory_space<vmem>>, vector<1x1xf32>
    %30 = vector.broadcast %29 : vector<1x1xf32> to vector<1x128xf32>
    %31 = arith.addf %28, %30 : vector<1x128xf32>
    %c0_10 = arith.constant 0 : index
    %c0_11 = arith.constant 0 : index
    %32 = vector.load %arg6[%c0_10, %c0_11] : memref<1x128xf32, #tpu.memory_space<vmem>>, vector<1x128xf32>
    tpu.vector_store %arg6[%c0_10, %c0_11], %31 {strides = array<i32>} : memref<1x128xf32, #tpu.memory_space<vmem>>, vector<1x128xf32>,
    return
  }
  func.func @transform_0(%arg0: i32) -> (i32, i32) {
    %c0_i32 = arith.constant 0 : i32
    %c0_i32_0 = arith.constant 0 : i32
    return %c0_i32, %arg0 : i32, i32
  }
  func.func @transform_1(%arg0: i32) -> (i32, i32) {
    %c0_i32 = arith.constant 0 : i32
    %c0_i32_0 = arith.constant 0 : i32
    %c0_i32_1 = arith.constant 0 : i32
    return %c0_i32, %c0_i32_0 : i32, i32
  }
  func.func @transform_2(%arg0: i32) -> (i32, i32) {
    %c0_i32 = arith.constant 0 : i32
    %c0_i32_0 = arith.constant 0 : i32
    %c0_i32_1 = arith.constant 0 : i32
    return %c0_i32, %c0_i32_0 : i32, i32
  }
  func.func @transform_3(%arg0: i32) -> (i32, i32) {
    %c0_i32 = arith.constant 0 : i32
    %c0_i32_0 = arith.constant 0 : i32
    %c0_i32_1 = arith.constant 0 : i32
    return %c0_i32, %c0_i32_0 : i32, i32
  }
  func.func @transform_4(%arg0: i32) -> (i32, i32) {
    %c0_i32 = arith.constant 0 : i32
    %c0_i32_0 = arith.constant 0 : i32
    %c0_i32_1 = arith.constant 0 : i32
    return %c0_i32, %c0_i32_0 : i32, i32
  }
  func.func @transform_5(%arg0: i32) -> (i32, i32) {
    %c0_i32 = arith.constant 0 : i32
    %c0_i32_0 = arith.constant 0 : i32
    return %c0_i32, %arg0 : i32, i32
  }
}

</mosaic_0001>

<bundles_post_ra>
// kernel: tpu_custom_call.1
= control target key start
LH: loop header
LB: loop body
LE: loop exit
PB: predicated region body
PF: predicated region fallthrough
CT: control target
= control target key end

     0   :  { %s230_s0 = inlined_call_operand.vmem [shape: f32[3,128], index: 0, kind: input, shape index: {}]   ;;  %s231_s1 = inlined_call_operand.vmem [shape: f32[16,3], index: 1, kind: input, shape index: {}]   ;;  %s232_s2 = inlined_call_operand.vmem [shape: f32[16,1], index: 2, kind: input, shape index: {}]   ;;  %s233_s3 = inlined_call_operand.vmem [shape: f32[16,1], index: 3, kind: input, shape index: {}]   ;;  %s234_s4 = inlined_call_operand.<no memory space> [shape: f32[1,1], index: 4, kind: input, shape index: {}]   ;;  %s235_s5 = inlined_call_operand.hbm [shape: f32[1,128], index: 5, kind: output, shape index: {}]  }
   0x1   :  { %v10_v0 = vstv %s234_s4 }
   0x2   :  { %11 = vst [vmem:[#allocation2] sm:$0x1] %v10_v0 }
   0x3   :  { %v24_v1 = vld [vmem:[%s231_s1] sm:$0xff]  ;;  %v169_v2 = vmov 1   ;;  %v170_v3 = vmov 0  }
   0x4   :  { %142 = vset.pattern.permute.xlu1 %v169_v2  ;;  %141 = vset.pattern.permute.xlu0 %v170_v3 }
   0x5   :  { %43 = vperm.xlu1 %142, %v24_v1   ;;  %28 = vperm.xlu0 %141, %v24_v1  }
   0x6   :  { %12 = vsyncpa [#allocation4], 0  ;;  %v25_v4 = vld [vmem:[%s231_s1 + $0x8] sm:$0xff]  ;;  %v171_v5 = vmov 2   ;;  %v74_v6 = vld [vmem:[%s232_s2] sm:$0xff]  ;;  %v36_v11 = vlaneseq }
   0x7   :  { %v75_v7 = vld [vmem:[%s232_s2 + $0x8] sm:$0xff]  ;;  %v90_v8 = vld [vmem:[%s233_s3] sm:$0xff] }
   0x8   :  { %v91_v10 = vld [vmem:[%s233_s3 + $0x8] sm:$0xff]  ;;  %v37_v12 = vshrl.u32 %v36_v11, 7  ;;  %v23_v15 = vld [vmem:[%s230_s0] sm:$0x7]  ;;  %s172_s0 = smov [#allocation3]  }
   0x9   :  { %47 = vperm.xlu1 %142, %v25_v4   ;;  %33 = vperm.xlu0 %141, %v25_v4   ;;  %v111_v9 = vld [vmem:[#allocation2] sm:$0x1]  ;;  %s129_s3 = sshll.u32 %s172_s0, 4  ;;  %s130_s3 = int_to_ptr.vmem [resolvable:$true] %s129_s3 }
   0xa   :  { %v52_v13 = vsub.s32 1, %v37_v12  ;;  %v38_v14 = vsub.s32 0, %v37_v12  ;;  %v68_v20 = vsub.s32 2, %v37_v12  ;;  %s147_s6 = scalar_lea.vmem %s130_s3, 16  ;;  %s151_s7 = scalar_lea.vmem %s130_s3, 32 }
   0xb   :  { %p148_p0 = scmp.ne.s32.totalorder %s130_s3, %s147_s6  ;;  %p152_p1 = scmp.lt.s32.totalorder %s130_s3, %s130_s3 }
   0xc   :  { %v53_v18 = vrot.slane %v23_v15, %v52_v13  ;;  %v39_v19 = vrot.slane %v23_v15, %v38_v14  ;;  %v69_v25 = vrot.slane %v23_v15, %v68_v20  ;;  %p153_p2 = scmp.lt.s32.totalorder %s151_s7, %s147_s6 }
   0xd   :  { %144 = vset.pattern.permute.xlu1 %v171_v5  ;;  %143 = vset.pattern.permute.xlu0 %v171_v5 }
   0xe   :  { %63 = vperm.xlu1 %144, %v25_v4   ;;  %59 = vperm.xlu0 %143, %v24_v1   ;;  %p154_p3 = por %p153_p2, %p152_p1 }
  0x10   :  { %p155_p4 = pnand %p154_p3, %p148_p0 }
  0x12   :  { %145 = vset.pattern.permute.xlu1 %v170_v3  ;;  %146 = vset.pattern.permute.xlu0 %v170_v3 }
  0x13   :  { %78 = vperm.xlu1 %145, %v74_v6   ;;  %83 = vperm.xlu0 %146, %v75_v7  }
  0x17   :  { %94 = vperm.xlu1 %145, %v90_v8   ;;  %114 = vperm.xlu0 %146, %v111_v9  }
  0x1b   :  { %99 = vperm.xlu1 %145, %v91_v10  }
  0x80   :  { %v44_v16 = vpop.permute.xlu1 %43  ;;  %v29_v17 = vpop.permute.xlu0 %28 }
  0x81   :  { %v54_v23 = vmul.f32 %v53_v18, %v44_v16  ;;  %v40_v24 = vmul.f32 %v39_v19, %v29_v17 }
  0x83   :  { %v56_v30 = vadd.f32 %v54_v23, %v40_v24 }
  0x84   :  { %v48_v21 = vpop.permute.xlu1 %47  ;;  %v34_v22 = vpop.permute.xlu0 %33 }
  0x85   :  { %v55_v26 = vmul.f32 %v53_v18, %v48_v21  ;;  %v41_v27 = vmul.f32 %v39_v19, %v34_v22 }
  0x87   :  { %v57_v33 = vadd.f32 %v55_v26, %v41_v27 }
  0x89   :  { %v64_v28 = vpop.permute.xlu1 %63  ;;  %v60_v29 = vpop.permute.xlu0 %59 }
  0x8a   :  { %v71_v31 = vmul.f32 %v69_v25, %v64_v28  ;;  %v70_v32 = vmul.f32 %v69_v25, %v60_v29 }
  0x8c   :  { %v72_v34 = vadd.f32 %v70_v32, %v56_v30  ;;  %v73_v35 = vadd.f32 %v71_v31, %v57_v33 }
  0x8e   :  { %v79_v36 = vpop.permute.xlu1 %78  ;;  %v84_v37 = vpop.permute.xlu0 %83 }
  0x8f   :  { %v86_v38 = vadd.f32 %v79_v36, %v72_v34  ;;  %v87_v39 = vadd.f32 %v84_v37, %v73_v35 }
  0x91   :  { %v88_v41 = vmax.f32 %v86_v38, 0.0  ;;  %v89_v42 = vmax.f32 %v87_v39, 0.0 }
  0x92   :  { %v95_v40 = vpop.permute.xlu1 %94  ;;  %v115_v51 = vpop.permute.xlu0 %114 }
  0x93   :  { %v102_v44 = vmul.f32 %v95_v40, %v88_v41  ;;  %v120_v53 = vrot.slane %v115_v51, %v38_v14 }
  0x96   :  { %v100_v43 = vpop.permute.xlu1 %99 }
  0x97   :  { %v103_v45 = vmul.f32 %v100_v43, %v89_v42 }
  0x99   :  { %v104_v46 = vadd.f32 %v103_v45, %v102_v44 }
  0x9b   :  { %v105_v47 = vrot.slane %v104_v46, 4 }
  0x9d   :  { %v106_v48 = vadd.f32 %v105_v47, %v104_v46 }
  0x9f   :  { %v107_v49 = vrot.slane %v106_v48, 2 }
  0xa1   :  { %v108_v50 = vadd.f32 %v107_v49, %v106_v48 }
  0xa3   :  { %v109_v52 = vrot.slane %v108_v50, 1 }
  0xa5   :  { %v110_v54 = vadd.f32 %v109_v52, %v108_v50 }
  0xa7   :  { %v121_v55 = vadd.f32 %v120_v53, %v110_v54 }
  0xa9   :  { %122 = vst [vmem:[#allocation3] sm:$0x1] %v121_v55 }
  0xaa   :  { %158 = shalt.err (!%p155_p4)
}
  0xab   :  { %132 = dma.vmem_to_hbm [thread:$0]  %s130_s3, 16, %s235_s5, [#allocation4]  }
  0xac   :  { %167 = dma.done.wait [#allocation4], 16  }
  0xad   :  { %168 = vsyncadd [#allocation4], 4294967280 }
  0xae   :  { %136 = vsyncpa [#allocation4], 1 }

</bundles_post_ra>
